<compile_context>
chip_gen: v6e
topology: v6e:2x2x1
jax: 0.10.0
libtpu: 0.0.40
codegen_flags: <defaults>
</compile_context>

<pallas_src>
import jax
import jax.numpy as jnp
from jax.experimental import pallas as pl
from jax.experimental.pallas import tpu as pltpu

EMB = 64          # embedding_dim
HID = 128         # content-net hidden width
PAD_FEAT = 128    # per-net padded content feature width (>= 16, 103, 4)
F1, F2, F3 = 256, 128, 64
OUT_PAD = 128     # lane-dense output width (real scalar broadcast across lanes)
BN_EPS = 1e-5
U_DIM, P_DIM, C_DIM = 16, 103, 4


def _round_up(x, m):
    return (x + m - 1) // m * m


# --------------------------------------------------------------------------- kernel

def _hybrid_kernel(emb_ref, cont_ref,
                   w1_ref, b1_ref, w2_ref, b2_ref,
                   f1e_ref, f1c_ref, fb1_ref,
                   f2_ref, fb2_ref, f3_ref, fb3_ref,
                   w4_ref, b4_ref,
                   out_ref):
    bf16 = jnp.bfloat16
    f32 = jnp.float32

    # Fused content nets: block-diagonal Linear -> ReLU -> (Dropout=id) -> Linear -> ReLU.
    h = jnp.dot(cont_ref[...].astype(bf16), w1_ref[...],
                preferred_element_type=f32) + b1_ref[...]
    h = jnp.maximum(h, 0.0)
    ce = jnp.dot(h.astype(bf16), w2_ref[...],
                 preferred_element_type=f32) + b2_ref[...]
    ce = jnp.maximum(ce, 0.0)                                  # (tile_b, 192)

    # Fusion layer 1 (BatchNorm folded): split-K sum of dots — no lane concatenate.
    f = (jnp.dot(emb_ref[...].astype(bf16), f1e_ref[...], preferred_element_type=f32)
         + jnp.dot(ce.astype(bf16), f1c_ref[...], preferred_element_type=f32)
         + fb1_ref[...])
    f = jnp.maximum(f, 0.0)

    f = jnp.maximum(jnp.dot(f.astype(bf16), f2_ref[...],
                            preferred_element_type=f32) + fb2_ref[...], 0.0)
    f = jnp.maximum(jnp.dot(f.astype(bf16), f3_ref[...],
                            preferred_element_type=f32) + fb3_ref[...], 0.0)

    # Final Linear(64, 1) as VPU multiply + lane reduction, then Sigmoid.
    logit = jnp.sum(f * w4_ref[...], axis=-1, keepdims=True) + b4_ref[...]
    out_ref[...] = jnp.broadcast_to(jax.nn.sigmoid(logit), out_ref.shape)


# ----------------------------------------------------------------------- param prep

def init_params(key, num_users, num_posts, num_companies,
                user_content_dim=U_DIM, post_content_dim=P_DIM,
                company_content_dim=C_DIM):
    ks = iter(jax.random.split(key, 32))

    def dense(din, dout):
        return jax.random.normal(next(ks), (din, dout), jnp.float32) * 0.05

    def bias(dout):
        return jax.random.normal(next(ks), (dout,), jnp.float32) * 0.05

    return {
        "user_emb": jax.random.normal(next(ks), (num_users, EMB), jnp.float32) * 0.05,
        "post_emb": jax.random.normal(next(ks), (num_posts, EMB), jnp.float32) * 0.05,
        "company_emb": jax.random.normal(next(ks), (num_companies, EMB), jnp.float32) * 0.05,
        # content nets
        "uw1": dense(user_content_dim, HID), "ub1": bias(HID),
        "uw2": dense(HID, EMB), "ub2": bias(EMB),
        "pw1": dense(post_content_dim, HID), "pb1": bias(HID),
        "pw2": dense(HID, EMB), "pb2": bias(EMB),
        "cw1": dense(company_content_dim, HID), "cb1": bias(HID),
        "cw2": dense(HID, EMB), "cb2": bias(EMB),
        # fusion layers
        "fw1": dense(6 * EMB, F1), "fb1": bias(F1),
        "bn_gamma": 1.0 + 0.1 * jax.random.normal(next(ks), (F1,), jnp.float32),
        "bn_beta": 0.1 * jax.random.normal(next(ks), (F1,), jnp.float32),
        "bn_mean": 0.1 * jax.random.normal(next(ks), (F1,), jnp.float32),
        "bn_var": jnp.abs(1.0 + 0.1 * jax.random.normal(next(ks), (F1,), jnp.float32)),
        "fw2": dense(F1, F2), "fb2": bias(F2),
        "fw3": dense(F2, F3), "fb3": bias(F3),
        "fw4": dense(F3, 1), "fb4": bias(1),
    }


def pack_params(params):
    """One-time transform of PyTorch-style params into kernel operands."""
    wdt = jnp.bfloat16

    def pad_rows(w, rows):
        return jnp.zeros((rows, w.shape[1]), w.dtype).at[: w.shape[0]].set(w)

    # Block-diagonal content layer 1: (3*PAD_FEAT, 3*HID) = (384, 384)
    w1 = jnp.zeros((3 * PAD_FEAT, 3 * HID), jnp.float32)
    w1 = w1.at[0:PAD_FEAT, 0:HID].set(pad_rows(params["uw1"], PAD_FEAT))
    w1 = w1.at[PAD_FEAT:2 * PAD_FEAT, HID:2 * HID].set(pad_rows(params["pw1"], PAD_FEAT))
    w1 = w1.at[2 * PAD_FEAT:, 2 * HID:].set(pad_rows(params["cw1"], PAD_FEAT))
    b1 = jnp.concatenate([params["ub1"], params["pb1"], params["cb1"]]).reshape(1, -1)

    # Block-diagonal content layer 2: (3*HID, 3*EMB) = (384, 192)
    w2 = jnp.zeros((3 * HID, 3 * EMB), jnp.float32)
    w2 = w2.at[0:HID, 0:EMB].set(params["uw2"])
    w2 = w2.at[HID:2 * HID, EMB:2 * EMB].set(params["pw2"])
    w2 = w2.at[2 * HID:, 2 * EMB:].set(params["cw2"])
    b2 = jnp.concatenate([params["ub2"], params["pb2"], params["cb2"]]).reshape(1, -1)

    # Fold BatchNorm1d(256) eval statistics into fusion layer 1.
    scale = params["bn_gamma"] / jnp.sqrt(params["bn_var"] + BN_EPS)
    shift = params["bn_beta"] - params["bn_mean"] * scale
    fw1 = params["fw1"] * scale[None, :]
    fb1 = (params["fb1"] * scale + shift).reshape(1, -1)

    return {
        "w1": w1.astype(wdt), "b1": b1,
        "w2": w2.astype(wdt), "b2": b2,
        "f1e": fw1[: 3 * EMB].astype(wdt),      # embedding half of fw1 (192, 256)
        "f1c": fw1[3 * EMB:].astype(wdt),       # content-embedding half   (192, 256)
        "fb1": fb1,
        "f2": params["fw2"].astype(wdt), "fb2": params["fb2"].reshape(1, -1),
        "f3": params["fw3"].astype(wdt), "fb3": params["fb3"].reshape(1, -1),
        "w4": params["fw4"].reshape(1, -1),     # (1, 64) f32, used on the VPU
        "b4": params["fb4"].reshape(1, 1),      # (1, 1)  f32
    }


# ------------------------------------------------------------------------- wrapper

def hybrid_forward(params, packed, user_ids, post_ids, company_ids,
                   user_content, post_content, company_content, *, tile_b=256):
    B = user_ids.shape[0]
    tile_b = min(tile_b, max(8, _round_up(B, 8)))   # don't over-pad tiny batches
    B_pad = _round_up(B, tile_b)

    # Embedding lookups (XLA gather glue; all hot-path matmuls live in the kernel).
    # TODO(synk): move the gathers into the kernel (PrefetchScalarGridSpec / manual DMA
    # from HBM tables) once tables are large enough that materializing rows matters.
    ue = jnp.take(params["user_emb"], user_ids, axis=0)
    pe = jnp.take(params["post_emb"], post_ids, axis=0)
    ce = jnp.take(params["company_emb"], company_ids, axis=0)
    emb = jnp.zeros((B_pad, 3 * EMB), jnp.float32)
    emb = emb.at[:B, 0:EMB].set(ue)
    emb = emb.at[:B, EMB:2 * EMB].set(pe)
    emb = emb.at[:B, 2 * EMB:].set(ce)

    # Packed content features, each net's features zero-padded to a 128-lane slot.
    cont = jnp.zeros((B_pad, 3 * PAD_FEAT), jnp.float32)
    cont = cont.at[:B, 0:U_DIM].set(user_content)
    cont = cont.at[:B, PAD_FEAT:PAD_FEAT + P_DIM].set(post_content)
    cont = cont.at[:B, 2 * PAD_FEAT:2 * PAD_FEAT + C_DIM].set(company_content)

    grid = (B_pad // tile_b,)

    def batch_spec(width):
        return pl.BlockSpec((tile_b, width), lambda i: (i, 0))

    def resident(arr):
        # Constant index_map -> DMA'd once, stays VMEM-resident across grid steps.
        return pl.BlockSpec(arr.shape, lambda i: (0,) * arr.ndim)

    w = packed
    weight_args = [w["w1"], w["b1"], w["w2"], w["b2"],
                   w["f1e"], w["f1c"], w["fb1"],
                   w["f2"], w["fb2"], w["f3"], w["fb3"],
                   w["w4"], w["b4"]]

    out = pl.pallas_call(
        _hybrid_kernel,
        grid=grid,
        out_shape=jax.ShapeDtypeStruct((B_pad, OUT_PAD), jnp.float32),
        in_specs=[batch_spec(3 * EMB), batch_spec(3 * PAD_FEAT)]
                 + [resident(a) for a in weight_args],
        out_specs=batch_spec(OUT_PAD),
        compiler_params=pltpu.CompilerParams(dimension_semantics=("parallel",)),
    )(emb, cont, *weight_args)

    # .squeeze() of the (B, 1) output -> (B,)
    return out[:B, 0]


# ---------------------------------------------------------------- pure-JAX reference

def reference_forward(params, user_ids, post_ids, company_ids, uc, pc, cc):
    """Pure-JAX f32 reference mirroring the PyTorch forward in eval mode."""
    ue = jnp.take(params["user_emb"], user_ids, axis=0)
    pe = jnp.take(params["post_emb"], post_ids, axis=0)
    ce = jnp.take(params["company_emb"], company_ids, axis=0)

    def mlp(x, w1, b1, w2, b2):
        h = jnp.maximum(x @ w1 + b1, 0.0)
        return jnp.maximum(h @ w2 + b2, 0.0)

    uce = mlp(uc, params["uw1"], params["ub1"], params["uw2"], params["ub2"])
    pce = mlp(pc, params["pw1"], params["pb1"], params["pw2"], params["pb2"])
    cce = mlp(cc, params["cw1"], params["cb1"], params["cw2"], params["cb2"])
    combined = jnp.concatenate([ue, pe, ce, uce, pce, cce], axis=1)

    h = combined @ params["fw1"] + params["fb1"]
    scale = params["bn_gamma"] / jnp.sqrt(params["bn_var"] + BN_EPS)
    shift = params["bn_beta"] - params["bn_mean"] * scale
    h = jnp.maximum(h * scale + shift, 0.0)
    h = jnp.maximum(h @ params["fw2"] + params["fb2"], 0.0)
    h = jnp.maximum(h @ params["fw3"] + params["fb3"], 0.0)
    return jnp.squeeze(jax.nn.sigmoid(h @ params["fw4"] + params["fb4"]), axis=-1)


# ----------------------------------------------------------------------------- main

if __name__ == "__main__":
    key = jax.random.PRNGKey(0)
    k_param, k_data = jax.random.split(key)

    num_users, num_posts, num_companies = 10, 12, 5
    params = init_params(k_param, num_users, num_posts, num_companies)
    packed = pack_params(params)

    def make_batch(k, batch):
        kiu, kip, kic, kuc, kpc, kcc = jax.random.split(k, 6)
        return (jax.random.randint(kiu, (batch,), 0, num_users, dtype=jnp.int32),
                jax.random.randint(kip, (batch,), 0, num_posts, dtype=jnp.int32),
                jax.random.randint(kic, (batch,), 0, num_companies, dtype=jnp.int32),
                jax.random.normal(kuc, (batch, U_DIM), jnp.float32),
                jax.random.normal(kpc, (batch, P_DIM), jnp.float32),
                jax.random.normal(kcc, (batch, C_DIM), jnp.float32))

    k_small, k_big = jax.random.split(k_data)
    # batch=2: single grid step; batch=300: pads to 512 -> 2-step pipelined grid.
    for batch, kb in ((2, k_small), (300, k_big)):
        args = make_batch(kb, batch)
        out = jax.block_until_ready(hybrid_forward(params, packed, *args))
        ref = reference_forward(params, *args)
        assert out.shape == (batch,), out.shape
        max_err = float(jnp.abs(out - ref).max())
        assert jnp.allclose(out, ref, atol=1e-2), (batch, max_err)

    print("KERNEL_OK")
</pallas_src>

<mosaic_0001>
module attributes {stable_mosaic.version = 11 : i64} {
  func.func @_hybrid_kernel(%arg0: i32, %arg1: memref<8x192xf32, #tpu.memory_space<vmem>>, %arg2: memref<8x384xf32, #tpu.memory_space<vmem>>, %arg3: memref<384x384xbf16, #tpu.memory_space<vmem>>, %arg4: memref<1x384xf32, #tpu.memory_space<vmem>>, %arg5: memref<384x192xbf16, #tpu.memory_space<vmem>>, %arg6: memref<1x192xf32, #tpu.memory_space<vmem>>, %arg7: memref<192x256xbf16, #tpu.memory_space<vmem>>, %arg8: memref<192x256xbf16, #tpu.memory_space<vmem>>, %arg9: memref<1x256xf32, #tpu.memory_space<vmem>>, %arg10: memref<256x128xbf16, #tpu.memory_space<vmem>>, %arg11: memref<1x128xf32, #tpu.memory_space<vmem>>, %arg12: memref<128x64xbf16, #tpu.memory_space<vmem>>, %arg13: memref<1x64xf32, #tpu.memory_space<vmem>>, %arg14: memref<1x64xf32, #tpu.memory_space<vmem>>, %arg15: memref<1x1xf32, #tpu.memory_space<vmem>>, %arg16: memref<8x128xf32, #tpu.memory_space<vmem>>) attributes {dimension_semantics = [#tpu.dimension_semantics<parallel>], iteration_bounds = array<i64: 1>, scalar_prefetch = 0 : i64, scratch_operands = 0 : i64, tpu.core_type = #tpu.core_type<tc>, window_params = [{transform_indices = @transform_0, window_bounds = array<i64: 8, 192>}, {transform_indices = @transform_1, window_bounds = array<i64: 8, 384>}, {pipeline_mode = #tpu.pipeline_mode<synchronous>, transform_indices = @transform_2, window_bounds = array<i64: 384, 384>}, {pipeline_mode = #tpu.pipeline_mode<synchronous>, transform_indices = @transform_3, window_bounds = array<i64: 1, 384>}, {pipeline_mode = #tpu.pipeline_mode<synchronous>, transform_indices = @transform_4, window_bounds = array<i64: 384, 192>}, {pipeline_mode = #tpu.pipeline_mode<synchronous>, transform_indices = @transform_5, window_bounds = array<i64: 1, 192>}, {pipeline_mode = #tpu.pipeline_mode<synchronous>, transform_indices = @transform_6, window_bounds = array<i64: 192, 256>}, {pipeline_mode = #tpu.pipeline_mode<synchronous>, transform_indices = @transform_7, window_bounds = array<i64: 192, 256>}, {pipeline_mode = #tpu.pipeline_mode<synchronous>, transform_indices = @transform_8, window_bounds = array<i64: 1, 256>}, {pipeline_mode = #tpu.pipeline_mode<synchronous>, transform_indices = @transform_9, window_bounds = array<i64: 256, 128>}, {pipeline_mode = #tpu.pipeline_mode<synchronous>, transform_indices = @transform_10, window_bounds = array<i64: 1, 128>}, {pipeline_mode = #tpu.pipeline_mode<synchronous>, transform_indices = @transform_11, window_bounds = array<i64: 128, 64>}, {pipeline_mode = #tpu.pipeline_mode<synchronous>, transform_indices = @transform_12, window_bounds = array<i64: 1, 64>}, {pipeline_mode = #tpu.pipeline_mode<synchronous>, transform_indices = @transform_13, window_bounds = array<i64: 1, 64>}, {pipeline_mode = #tpu.pipeline_mode<synchronous>, transform_indices = @transform_14, window_bounds = array<i64: 1, 1>}, {transform_indices = @transform_15, window_bounds = array<i64: 8, 128>}]} {
    %c0 = arith.constant 0 : index
    %c0_0 = arith.constant 0 : index
    %0 = vector.load %arg2[%c0, %c0_0] : memref<8x384xf32, #tpu.memory_space<vmem>>, vector<8x384xf32>
    %1 = arith.truncf %0 : vector<8x384xf32> to vector<8x384xbf16>
    %c0_1 = arith.constant 0 : index
    %c0_2 = arith.constant 0 : index
    %2 = vector.load %arg3[%c0_1, %c0_2] : memref<384x384xbf16, #tpu.memory_space<vmem>>, vector<384x384xbf16>
    %cst = arith.constant dense<0.000000e+00> : vector<8x384xf32>
    %3 = tpu.matmul %1, %2, %cst {dimension_numbers = #tpu.dot_dimension_numbers<[1], [0], [0], [1], [0, 0, 1, 1], [], []>} : vector<8x384xbf16>, vector<384x384xbf16>, vector<8x384xf32> -> vector<8x384xf32>
    %c0_3 = arith.constant 0 : index
    %c0_4 = arith.constant 0 : index
    %4 = vector.load %arg4[%c0_3, %c0_4] : memref<1x384xf32, #tpu.memory_space<vmem>>, vector<1x384xf32>
    %5 = vector.broadcast %4 : vector<1x384xf32> to vector<8x384xf32>
    %6 = arith.addf %3, %5 : vector<8x384xf32>
    %cst_5 = arith.constant 0.000000e+00 : f32
    %7 = vector.broadcast %cst_5 : f32 to vector<8x384xf32>
    %8 = arith.maximumf %6, %7 : vector<8x384xf32>
    %9 = arith.truncf %8 : vector<8x384xf32> to vector<8x384xbf16>
    %c0_6 = arith.constant 0 : index
    %c0_7 = arith.constant 0 : index
    %10 = vector.load %arg5[%c0_6, %c0_7] : memref<384x192xbf16, #tpu.memory_space<vmem>>, vector<384x192xbf16>
    %cst_8 = arith.constant dense<0.000000e+00> : vector<8x192xf32>
    %11 = tpu.matmul %9, %10, %cst_8 {dimension_numbers = #tpu.dot_dimension_numbers<[1], [0], [0], [1], [0, 0, 1, 1], [], []>} : vector<8x384xbf16>, vector<384x192xbf16>, vector<8x192xf32> -> vector<8x192xf32>
    %c0_9 = arith.constant 0 : index
    %c0_10 = arith.constant 0 : index
    %12 = vector.load %arg6[%c0_9, %c0_10] : memref<1x192xf32, #tpu.memory_space<vmem>>, vector<1x192xf32>
    %13 = vector.broadcast %12 : vector<1x192xf32> to vector<8x192xf32>
    %14 = arith.addf %11, %13 : vector<8x192xf32>
    %cst_11 = arith.constant 0.000000e+00 : f32
    %15 = vector.broadcast %cst_11 : f32 to vector<8x192xf32>
    %16 = arith.maximumf %14, %15 : vector<8x192xf32>
    %c0_12 = arith.constant 0 : index
    %c0_13 = arith.constant 0 : index
    %17 = vector.load %arg1[%c0_12, %c0_13] : memref<8x192xf32, #tpu.memory_space<vmem>>, vector<8x192xf32>
    %18 = arith.truncf %17 : vector<8x192xf32> to vector<8x192xbf16>
    %c0_14 = arith.constant 0 : index
    %c0_15 = arith.constant 0 : index
    %19 = vector.load %arg7[%c0_14, %c0_15] : memref<192x256xbf16, #tpu.memory_space<vmem>>, vector<192x256xbf16>
    %cst_16 = arith.constant dense<0.000000e+00> : vector<8x256xf32>
    %20 = tpu.matmul %18, %19, %cst_16 {dimension_numbers = #tpu.dot_dimension_numbers<[1], [0], [0], [1], [0, 0, 1, 1], [], []>} : vector<8x192xbf16>, vector<192x256xbf16>, vector<8x256xf32> -> vector<8x256xf32>
    %21 = arith.truncf %16 : vector<8x192xf32> to vector<8x192xbf16>
    %c0_17 = arith.constant 0 : index
    %c0_18 = arith.constant 0 : index
    %22 = vector.load %arg8[%c0_17, %c0_18] : memref<192x256xbf16, #tpu.memory_space<vmem>>, vector<192x256xbf16>
    %cst_19 = arith.constant dense<0.000000e+00> : vector<8x256xf32>
    %23 = tpu.matmul %21, %22, %cst_19 {dimension_numbers = #tpu.dot_dimension_numbers<[1], [0], [0], [1], [0, 0, 1, 1], [], []>} : vector<8x192xbf16>, vector<192x256xbf16>, vector<8x256xf32> -> vector<8x256xf32>
    %24 = arith.addf %20, %23 : vector<8x256xf32>
    %c0_20 = arith.constant 0 : index
    %c0_21 = arith.constant 0 : index
    %25 = vector.load %arg9[%c0_20, %c0_21] : memref<1x256xf32, #tpu.memory_space<vmem>>, vector<1x256xf32>
    %26 = vector.broadcast %25 : vector<1x256xf32> to vector<8x256xf32>
    %27 = arith.addf %24, %26 : vector<8x256xf32>
    %cst_22 = arith.constant 0.000000e+00 : f32
    %28 = vector.broadcast %cst_22 : f32 to vector<8x256xf32>
    %29 = arith.maximumf %27, %28 : vector<8x256xf32>
    %30 = arith.truncf %29 : vector<8x256xf32> to vector<8x256xbf16>
    %c0_23 = arith.constant 0 : index
    %c0_24 = arith.constant 0 : index
    %31 = vector.load %arg10[%c0_23, %c0_24] : memref<256x128xbf16, #tpu.memory_space<vmem>>, vector<256x128xbf16>
    %cst_25 = arith.constant dense<0.000000e+00> : vector<8x128xf32>
    %32 = tpu.matmul %30, %31, %cst_25 {dimension_numbers = #tpu.dot_dimension_numbers<[1], [0], [0], [1], [0, 0, 1, 1], [], []>} : vector<8x256xbf16>, vector<256x128xbf16>, vector<8x128xf32> -> vector<8x128xf32>
    %c0_26 = arith.constant 0 : index
    %c0_27 = arith.constant 0 : index
    %33 = vector.load %arg11[%c0_26, %c0_27] : memref<1x128xf32, #tpu.memory_space<vmem>>, vector<1x128xf32>
    %34 = vector.broadcast %33 : vector<1x128xf32> to vector<8x128xf32>
    %35 = arith.addf %32, %34 : vector<8x128xf32>
    %cst_28 = arith.constant 0.000000e+00 : f32
    %36 = vector.broadcast %cst_28 : f32 to vector<8x128xf32>
    %37 = arith.maximumf %35, %36 : vector<8x128xf32>
    %38 = arith.truncf %37 : vector<8x128xf32> to vector<8x128xbf16>
    %c0_29 = arith.constant 0 : index
    %c0_30 = arith.constant 0 : index
    %39 = vector.load %arg12[%c0_29, %c0_30] : memref<128x64xbf16, #tpu.memory_space<vmem>>, vector<128x64xbf16>
    %cst_31 = arith.constant dense<0.000000e+00> : vector<8x64xf32>
    %40 = tpu.matmul %38, %39, %cst_31 {dimension_numbers = #tpu.dot_dimension_numbers<[1], [0], [0], [1], [0, 0, 1, 1], [], []>} : vector<8x128xbf16>, vector<128x64xbf16>, vector<8x64xf32> -> vector<8x64xf32>
    %c0_32 = arith.constant 0 : index
    %c0_33 = arith.constant 0 : index
    %41 = vector.load %arg13[%c0_32, %c0_33] : memref<1x64xf32, #tpu.memory_space<vmem>>, vector<1x64xf32>
    %42 = vector.broadcast %41 : vector<1x64xf32> to vector<8x64xf32>
    %43 = arith.addf %40, %42 : vector<8x64xf32>
    %cst_34 = arith.constant 0.000000e+00 : f32
    %44 = vector.broadcast %cst_34 : f32 to vector<8x64xf32>
    %45 = arith.maximumf %43, %44 : vector<8x64xf32>
    %c0_35 = arith.constant 0 : index
    %c0_36 = arith.constant 0 : index
    %46 = vector.load %arg14[%c0_35, %c0_36] : memref<1x64xf32, #tpu.memory_space<vmem>>, vector<1x64xf32>
    %47 = vector.broadcast %46 : vector<1x64xf32> to vector<8x64xf32>
    %48 = arith.mulf %45, %47 : vector<8x64xf32>
    %cst_37 = arith.constant dense<0.000000e+00> : vector<8xf32>
    %49 = vector.multi_reduction <add>, %48, %cst_37 [1] : vector<8x64xf32> to vector<8xf32>
    %50 = vector.shape_cast %49 : vector<8xf32> to vector<8x1xf32>
    %c0_38 = arith.constant 0 : index
    %c0_39 = arith.constant 0 : index
    %51 = vector.load %arg15[%c0_38, %c0_39] : memref<1x1xf32, #tpu.memory_space<vmem>>, vector<1x1xf32>
    %52 = vector.broadcast %51 : vector<1x1xf32> to vector<8x1xf32>
    %53 = arith.addf %50, %52 : vector<8x1xf32>
    %54 = arith.negf %53 : vector<8x1xf32>
    %55 = math.exp %54 : vector<8x1xf32>
    %cst_40 = arith.constant 1.000000e+00 : f32
    %56 = vector.broadcast %cst_40 : f32 to vector<8x1xf32>
    %57 = arith.addf %56, %55 : vector<8x1xf32>
    %58 = arith.divf %56, %57 : vector<8x1xf32>
    %59 = vector.shape_cast %58 : vector<8x1xf32> to vector<8x1xf32>
    %60 = vector.broadcast %59 : vector<8x1xf32> to vector<8x128xf32>
    %c0_41 = arith.constant 0 : index
    %c0_42 = arith.constant 0 : index
    %61 = vector.load %arg16[%c0_41, %c0_42] : memref<8x128xf32, #tpu.memory_space<vmem>>, vector<8x128xf32>
    tpu.vector_store %arg16[%c0_41, %c0_42], %60 {strides = array<i32>} : memref<8x128xf32, #tpu.memory_space<vmem>>, vector<8x128xf32>,
    return
  }
  func.func @transform_0(%arg0: i32) -> (i32, i32) {
    %c0_i32 = arith.constant 0 : i32
    %c0_i32_0 = arith.constant 0 : i32
    return %arg0, %c0_i32 : i32, i32
  }
  func.func @transform_1(%arg0: i32) -> (i32, i32) {
    %c0_i32 = arith.constant 0 : i32
    %c0_i32_0 = arith.constant 0 : i32
    return %arg0, %c0_i32 : i32, i32
  }
  func.func @transform_2(%arg0: i32) -> (i32, i32) {
    %c0_i32 = arith.constant 0 : i32
    %c0_i32_0 = arith.constant 0 : i32
    %c0_i32_1 = arith.constant 0 : i32
    return %c0_i32, %c0_i32_0 : i32, i32
  }
  func.func @transform_3(%arg0: i32) -> (i32, i32) {
    %c0_i32 = arith.constant 0 : i32
    %c0_i32_0 = arith.constant 0 : i32
    %c0_i32_1 = arith.constant 0 : i32
    return %c0_i32, %c0_i32_0 : i32, i32
  }
  func.func @transform_4(%arg0: i32) -> (i32, i32) {
    %c0_i32 = arith.constant 0 : i32
    %c0_i32_0 = arith.constant 0 : i32
    %c0_i32_1 = arith.constant 0 : i32
    return %c0_i32, %c0_i32_0 : i32, i32
  }
  func.func @transform_5(%arg0: i32) -> (i32, i32) {
    %c0_i32 = arith.constant 0 : i32
    %c0_i32_0 = arith.constant 0 : i32
    %c0_i32_1 = arith.constant 0 : i32
    return %c0_i32, %c0_i32_0 : i32, i32
  }
  func.func @transform_6(%arg0: i32) -> (i32, i32) {
    %c0_i32 = arith.constant 0 : i32
    %c0_i32_0 = arith.constant 0 : i32
    %c0_i32_1 = arith.constant 0 : i32
    return %c0_i32, %c0_i32_0 : i32, i32
  }
  func.func @transform_7(%arg0: i32) -> (i32, i32) {
    %c0_i32 = arith.constant 0 : i32
    %c0_i32_0 = arith.constant 0 : i32
    %c0_i32_1 = arith.constant 0 : i32
    return %c0_i32, %c0_i32_0 : i32, i32
  }
  func.func @transform_8(%arg0: i32) -> (i32, i32) {
    %c0_i32 = arith.constant 0 : i32
    %c0_i32_0 = arith.constant 0 : i32
    %c0_i32_1 = arith.constant 0 : i32
    return %c0_i32, %c0_i32_0 : i32, i32
  }
  func.func @transform_9(%arg0: i32) -> (i32, i32) {
    %c0_i32 = arith.constant 0 : i32
    %c0_i32_0 = arith.constant 0 : i32
    %c0_i32_1 = arith.constant 0 : i32
    return %c0_i32, %c0_i32_0 : i32, i32
  }
  func.func @transform_10(%arg0: i32) -> (i32, i32) {
    %c0_i32 = arith.constant 0 : i32
    %c0_i32_0 = arith.constant 0 : i32
    %c0_i32_1 = arith.constant 0 : i32
    return %c0_i32, %c0_i32_0 : i32, i32
  }
  func.func @transform_11(%arg0: i32) -> (i32, i32) {
    %c0_i32 = arith.constant 0 : i32
    %c0_i32_0 = arith.constant 0 : i32
    %c0_i32_1 = arith.constant 0 : i32
    return %c0_i32, %c0_i32_0 : i32, i32
  }
  func.func @transform_12(%arg0: i32) -> (i32, i32) {
    %c0_i32 = arith.constant 0 : i32
    %c0_i32_0 = arith.constant 0 : i32
    %c0_i32_1 = arith.constant 0 : i32
    return %c0_i32, %c0_i32_0 : i32, i32
  }
  func.func @transform_13(%arg0: i32) -> (i32, i32) {
    %c0_i32 = arith.constant 0 : i32
    %c0_i32_0 = arith.constant 0 : i32
    %c0_i32_1 = arith.constant 0 : i32
    return %c0_i32, %c0_i32_0 : i32, i32
  }
  func.func @transform_14(%arg0: i32) -> (i32, i32) {
    %c0_i32 = arith.constant 0 : i32
    %c0_i32_0 = arith.constant 0 : i32
    %c0_i32_1 = arith.constant 0 : i32
    return %c0_i32, %c0_i32_0 : i32, i32
  }
  func.func @transform_15(%arg0: i32) -> (i32, i32) {
    %c0_i32 = arith.constant 0 : i32
    %c0_i32_0 = arith.constant 0 : i32
    return %arg0, %c0_i32 : i32, i32
  }
}

</mosaic_0001>

<bundles_post_ra>
// kernel: tpu_custom_call.1
= control target key start
LH: loop header
LB: loop body
LE: loop exit
PB: predicated region body
PF: predicated region fallthrough
CT: control target
= control target key end

     0   :  { %s3212_s0 = inlined_call_operand.hbm [shape: f32[8,192], index: 0, kind: input, shape index: {}]   ;;  %s3213_s1 = inlined_call_operand.hbm [shape: f32[8,384], index: 1, kind: input, shape index: {}]   ;;  %s3214_s2 = inlined_call_operand.vmem [shape: bf16[384,384], index: 2, kind: input, shape index: {}]   ;;  %s3215_s3 = inlined_call_operand.vmem [shape: f32[1,384], index: 3, kind: input, shape index: {}]   ;;  %s3216_s4 = inlined_call_operand.vmem [shape: bf16[384,192], index: 4, kind: input, shape index: {}]   ;;  %s3217_s5 = inlined_call_operand.vmem [shape: f32[1,192], index: 5, kind: input, shape index: {}]   ;;  %s3218_s6 = inlined_call_operand.vmem [shape: bf16[192,256], index: 6, kind: input, shape index: {}]   ;;  %s3219_s7 = inlined_call_operand.hbm [shape: bf16[192,256], index: 7, kind: input, shape index: {}]   ;;  %s3220_s8 = inlined_call_operand.vmem [shape: f32[1,256], index: 8, kind: input, shape index: {}]   ;;  %s3221_s9 = inlined_call_operand.hbm [shape: bf16[256,128], index: 9, kind: input, shape index: {}]   ;;  %s3222_s10 = inlined_call_operand.vmem [shape: f32[1,128], index: 10, kind: input, shape index: {}]   ;;  %s3223_s11 = inlined_call_operand.vmem [shape: bf16[128,64], index: 11, kind: input, shape index: {}]   ;;  %s3224_s12 = inlined_call_operand.vmem [shape: f32[1,64], index: 12, kind: input, shape index: {}]   ;;  %s3225_s13 = inlined_call_operand.vmem [shape: f32[1,64], index: 13, kind: input, shape index: {}]   ;;  %s3226_s14 = inlined_call_operand.<no memory space> [shape: f32[1,1], index: 14, kind: input, shape index: {}]   ;;  %s3227_s15 = inlined_call_operand.hbm [shape: f32[8,128], index: 15, kind: output, shape index: {}]  }
   0x1   :  { %v20_v0 = vstv %s3226_s14 }
   0x2   :  { %21 = vst [vmem:[#allocation2] sm:$0x1] %v20_v0 }
   0x3   :  { %22 = vsyncpa [#allocation4], 0 }
   0x4   :  { %23 = vsyncpa [#allocation7], 0 }
   0x5   :  { %24 = vsyncpa [#allocation10], 0 }
   0x6   :  { %25 = vsyncpa [#allocation5], 0  ;;  %s2588_s20 = smov [#allocation6]   ;;  %s2589_s22 = smov [#allocation3]  }
   0x7   :  { %s42_s21 = sshll.u32 %s2588_s20, 4  ;;  %s32_s23 = sshll.u32 %s2589_s22, 4  ;;  %s43_s21 = int_to_ptr.vmem [resolvable:$true] %s42_s21  ;;  %s33_s23 = int_to_ptr.vmem [resolvable:$true] %s32_s23 }
   0x8   :  { %s2488_s24 = scalar_lea.vmem %s43_s21, 384  ;;  %p2493_p1 = scmp.lt.s32.totalorder %s43_s21, %s43_s21 }
   0x9   :  { %p2489_p0 = scmp.ne.s32.totalorder %s43_s21, %s2488_s24  ;;  %p2494_p2 = scmp.lt.s32.totalorder %s2488_s24, %s2488_s24 }
   0xb   :  { %p2495_p3 = por %p2494_p2, %p2493_p1 }
   0xd   :  { %p2496_p4 = pnand %p2495_p3, %p2489_p0 }
   0xf   :  { %2499 = shalt.err (!%p2496_p4)
}
  0x10   :  { %45 = dma.hbm_to_vmem [thread:$0]  %s3213_s1, 384, %s43_s21, [#allocation7]  }
  0x11   :  { %s2508_s26 = scalar_lea.vmem %s33_s23, 256  ;;  %p2513_p6 = scmp.lt.s32.totalorder %s33_s23, %s33_s23 }
  0x12   :  { %p2509_p5 = scmp.ne.s32.totalorder %s33_s23, %s2508_s26  ;;  %p2514_p7 = scmp.lt.s32.totalorder %s2508_s26, %s2508_s26 }
  0x14   :  { %p2515_p8 = por %p2514_p7, %p2513_p6 }
  0x16   :  { %p2516_p9 = pnand %p2515_p8, %p2509_p5 }
  0x18   :  { %2519 = shalt.err (!%p2516_p9)
}
  0x19   :  { %35 = dma.hbm_to_vmem [thread:$0]  %s3212_s0, 256, %s33_s23, [#allocation4]  }
  0x1a   :  { %s2590_s29 = smov [#allocation8]  }
  0x1b   :  { %s61_s30 = sshll.u32 %s2590_s29, 4  ;;  %s62_s30 = int_to_ptr.vmem [resolvable:$true] %s61_s30 }
  0x1c   :  { %s2528_s16 = scalar_lea.vmem %s62_s30, 3072  ;;  %p2533_p11 = scmp.lt.s32.totalorder %s62_s30, %s62_s30 }
  0x1d   :  { %p2529_p10 = scmp.ne.s32.totalorder %s62_s30, %s2528_s16  ;;  %p2534_p12 = scmp.lt.s32.totalorder %s2528_s16, %s2528_s16 }
  0x1f   :  { %p2535_p13 = por %p2534_p12, %p2533_p11 }
  0x21   :  { %p2536_p0 = pnand %p2535_p13, %p2529_p10 }
  0x23   :  { %2539 = shalt.err (!%p2536_p0)
}
  0x24   :  { %s2591_s1 = smov 128   ;;  %s2592_s17 = smov 8  }
  0x25   :  { %67 = dma.hbm_to_vmem [thread:$0]  %s3219_s7, 3072, %s62_s30, [#allocation7], %s2591_s1, %s2591_s1, %s2592_s17  }
  0x26   :  { %s2593_s20 = smov [#allocation9]  }
  0x27   :  { %s75_s21 = sshll.u32 %s2593_s20, 4  ;;  %s76_s21 = int_to_ptr.vmem [resolvable:$true] %s75_s21 }
  0x28   :  { %s2548_s0 = scalar_lea.vmem %s76_s21, 2048  ;;  %p2553_p2 = scmp.lt.s32.totalorder %s76_s21, %s76_s21 }
  0x29   :  { %p2549_p1 = scmp.ne.s32.totalorder %s76_s21, %s2548_s0  ;;  %p2554_p3 = scmp.lt.s32.totalorder %s2548_s0, %s2548_s0 }
  0x2b   :  { %p2555_p4 = por %p2554_p3, %p2553_p2 }
  0x2d   :  { %p2556_p5 = pnand %p2555_p4, %p2549_p1 }
  0x2f   :  { %2559 = shalt.err (!%p2556_p5)
}
  0x30   :  { %s2594_s22 = smov 64   ;;  %s2595_s23 = smov 4  }
  0x31   :  { %81 = dma.hbm_to_vmem [thread:$0]  %s3221_s9, 2048, %s76_s21, [#allocation10], %s2594_s22, %s2594_s22, %s2595_s23  }
  0x32   :  { %2580 = dma.done.wait [#allocation4], 256  }
  0x33   :  { %2581 = vsyncadd [#allocation4], 4294967040 }
  0x34   :  { %2582 = dma.done.wait [#allocation7], 3456  }
  0x35   :  { %2583 = vsyncadd [#allocation7], 4294963840 }
  0x36   :  { %2584 = dma.done.wait [#allocation10], 2048  }
  0x37   :  { %2585 = vsyncadd [#allocation10], 4294965248  ;;  %v2596_v1 = vmov 0   ;;  %v2212_v2 = vld [vmem:[%s3214_s2 + $0xac] ss:$12 sps:$4 sm:$0xff]   ;;  %v107_v39 = vld [vmem:[#allocation6 + $0x10] sm:$0xff] }
  0x38   :  { %681 = vmatprep.mubr.bf16.mxu1 %v2596_v1  ;;  %2211 = vset.pattern.permute.xlu0 %v2596_v1  ;;  %v2214_v3 = vld [vmem:[%s3214_s2 + $0xa8] ss:$12 sps:$4 sm:$0xff]   ;;  %v2217_v5 = vld [vmem:[%s3214_s2 + $0x90] ss:$12 sps:$4 sm:$0xff]   ;;  %v2220_v7 = vld [vmem:[%s3214_s2 + $0x78] ss:$12 sps:$4 sm:$0xff]   ;;  %v2817_v43 = vpack.c.bf16 %v107_v39, %v107_v39 }
  0x39   :  { %608 = vmatprep.subr.bf16.mxu0 %v2212_v2  ;;  %v2215_v4 = vld [vmem:[%s3214_s2 + $0x94] ss:$12 sps:$4 sm:$0xff]   ;;  %v2218_v6 = vld [vmem:[%s3214_s2 + $0x7c] ss:$12 sps:$4 sm:$0xff]   ;;  %v2221_v8 = vld [vmem:[%s3214_s2 + $0x64] ss:$12 sps:$4 sm:$0xff]  }
  0x3a   :  { %609 = vmatpush1.bf16.msra.mxu0 %v2214_v3  ;;  %v2229_v9 = vld [vmem:[%s3214_s2 + $0x22c] ss:$12 sps:$4 sm:$0xff]   ;;  %v2232_v10 = vld [vmem:[%s3214_s2 + $0x228] ss:$12 sps:$4 sm:$0xff]   ;;  %v2238_v13 = vld [vmem:[%s3214_s2 + $0x210] ss:$12 sps:$4 sm:$0xff]  }
  0x3b   :  { %610 = vmatprep.subr.bf16.mxu0 %v2215_v4  ;;  %649 = vmatprep.subr.bf16.mxu1 %v2229_v9  ;;  %v2223_v11 = vld [vmem:[%s3214_s2 + $0x60] ss:$12 sps:$4 sm:$0xff]   ;;  %v2241_v15 = vld [vmem:[%s3214_s2 + $0x1fc] ss:$12 sps:$4 sm:$0xff]   ;;  %v2244_v17 = vld [vmem:[%s3214_s2 + $0x1f8] ss:$12 sps:$4 sm:$0xff]  }
  0x3c   :  { %650 = vmatpush1.bf16.msra.mxu1 %v2232_v10  ;;  %v2235_v12 = vld [vmem:[%s3214_s2 + $0x214] ss:$12 sps:$4 sm:$0xff]   ;;  %v2224_v14 = vld [vmem:[%s3214_s2 + $0x4c] ss:$12 sps:$4 sm:$0xff]   ;;  %v2247_v19 = vld [vmem:[%s3214_s2 + $0x1e4] ss:$12 sps:$4 sm:$0xff]  }
  0x3d   :  { %651 = vmatprep.subr.bf16.mxu1 %v2235_v12  ;;  %v2226_v16 = vld [vmem:[%s3214_s2 + $0x48] ss:$12 sps:$4 sm:$0xff]   ;;  %v2231_v20 = vld [vmem:[%s3214_s2 + $0x30] ss:$12 sps:$4 sm:$0xff]   ;;  %v2250_v22 = vld [vmem:[%s3214_s2 + $0x1e0] ss:$12 sps:$4 sm:$0xff]  }
  0x3e   :  { %611 = vmatpush1.bf16.msra.mxu0 %v2217_v5  ;;  %v2227_v18 = vld [vmem:[%s3214_s2 + $0x34] ss:$12 sps:$4 sm:$0xff]   ;;  %v2233_v21 = vld [vmem:[%s3214_s2 + $0x1c] ss:$12 sps:$4 sm:$0xff]   ;;  %v2253_v23 = vld [vmem:[%s3214_s2 + $0x1cc] ss:$12 sps:$4 sm:$0xff]  }
  0x3f   :  { %612 = vmatprep.subr.bf16.mxu0 %v2218_v6  ;;  %v2237_v24 = vld [vmem:[%s3214_s2 + $0x18] ss:$12 sps:$4 sm:$0xff]   ;;  %v2256_v25 = vld [vmem:[%s3214_s2 + $0x1c8] ss:$12 sps:$4 sm:$0xff]   ;;  %v2243_v28 = vld [vmem:[%s3214_s2] ss:$12 sps:$4 sm:$0xff]  }
  0x40   :  { %652 = vmatpush1.bf16.msra.mxu1 %v2238_v13  ;;  %v2239_v26 = vld [vmem:[%s3214_s2 + $0x4] ss:$12 sps:$4 sm:$0xff]   ;;  %v2259_v27 = vld [vmem:[%s3214_s2 + $0x1b4] ss:$12 sps:$4 sm:$0xff]   ;;  %v2245_v29 = vld [vmem:[%s3214_s2 + $0x16c] ss:$12 sps:$4 sm:$0xff]  }
  0x41   :  { %653 = vmatprep.subr.bf16.mxu1 %v2241_v15  ;;  %v2262_v30 = vld [vmem:[%s3214_s2 + $0x1b0] ss:$12 sps:$4 sm:$0xff]   ;;  %v2249_v32 = vld [vmem:[%s3214_s2 + $0x168] ss:$12 sps:$4 sm:$0xff]   ;;  %v2268_v34 = vld [vmem:[%s3214_s2 + $0x198] ss:$12 sps:$4 sm:$0xff]  }
  0x42   :  { %613 = vmatpush1.bf16.msra.mxu0 %v2220_v7  ;;  %v2265_v31 = vld [vmem:[%s3214_s2 + $0x19c] ss:$12 sps:$4 sm:$0xff]   ;;  %v2251_v33 = vld [vmem:[%s3214_s2 + $0x154] ss:$12 sps:$4 sm:$0xff]   ;;  %v2271_v35 = vld [vmem:[%s3214_s2 + $0x184] ss:$12 sps:$4 sm:$0xff]  }
  0x43   :  { %614 = vmatprep.subr.bf16.mxu0 %v2221_v8  ;;  %v2255_v36 = vld [vmem:[%s3214_s2 + $0x150] ss:$12 sps:$4 sm:$0xff]   ;;  %v2274_v38 = vld [vmem:[%s3214_s2 + $0x180] ss:$12 sps:$4 sm:$0xff]   ;;  %v2261_v41 = vld [vmem:[%s3214_s2 + $0x138] ss:$12 sps:$4 sm:$0xff]  }
  0x44   :  { %654 = vmatpush1.bf16.msra.mxu1 %v2244_v17  ;;  %v2257_v37 = vld [vmem:[%s3214_s2 + $0x13c] ss:$12 sps:$4 sm:$0xff]   ;;  %v2263_v42 = vld [vmem:[%s3214_s2 + $0x124] ss:$12 sps:$4 sm:$0xff]   ;;  %v2267_v48 = vld [vmem:[%s3214_s2 + $0x120] ss:$12 sps:$4 sm:$0xff]  }
  0x45   :  { %655 = vmatprep.subr.bf16.mxu1 %v2247_v19  ;;  %v2277_v40 = vld [vmem:[%s3214_s2 + $0x170] ss:$12 sps:$4 sm:$0xff]   ;;  %v2282_v47 = vld [vmem:[%s3214_s2 + $0x158] ss:$12 sps:$4 sm:$0xff]   ;;  %v2287_v51 = vld [vmem:[%s3214_s2 + $0x140] ss:$12 sps:$4 sm:$0xff]  }
  0x46   :  { %615 = vmatpush1.bf16.msra.mxu0 %v2223_v11  ;;  %v106_v44 = vld [vmem:[#allocation6 + $0x8] sm:$0xff]  ;;  %v2273_v52 = vld [vmem:[%s3214_s2 + $0x108] ss:$12 sps:$4 sm:$0xff]   ;;  %v2285_v61 = vld [vmem:[%s3214_s2 + $0xc4] ss:$12 sps:$4 sm:$0xff]   ;;  %v2597_v8 = vmov 0.0  }
  0x47   :  { %616 = vmatprep.subr.bf16.mxu0 %v2224_v14  ;;  %v2279_v45 = vld [vmem:[%s3214_s2 + $0xb0] ss:$12 sps:$4 sm:$0xff]   ;;  %v109_v46 = vpack.c.bf16 %v106_v44, %v106_v44  ;;  %v2269_v49 = vld [vmem:[%s3214_s2 + $0x10c] ss:$12 sps:$4 sm:$0xff]   ;;  %v2275_v53 = vld [vmem:[%s3214_s2 + $0xf4] ss:$12 sps:$4 sm:$0xff]  }
  0x48   :  { %656 = vmatpush1.bf16.msra.mxu1 %v2250_v22  ;;  %v2284_v50 = vld [vmem:[%s3214_s2 + $0x98] ss:$12 sps:$4 sm:$0xff]   ;;  %v2289_v54 = vld [vmem:[%s3214_s2 + $0x80] ss:$12 sps:$4 sm:$0xff]   ;;  %v2290_v55 = vld [vmem:[%s3214_s2 + $0x128] ss:$12 sps:$4 sm:$0xff]  }
  0x49   :  { %657 = vmatprep.subr.bf16.mxu1 %v2253_v23  ;;  %640 = vmatprep.mubr.bf16.mxu0 %v109_v46  ;;  %v2278_v56 = vld [vmem:[%s3214_s2 + $0xf0] ss:$12 sps:$4 sm:$0xff]   ;;  %v2291_v58 = vld [vmem:[%s3214_s2 + $0x68] ss:$12 sps:$4 sm:$0xff]   ;;  %v2283_v60 = vld [vmem:[%s3214_s2 + $0xd8] ss:$12 sps:$4 sm:$0xff]  }
  0x4a   :  { %617 = vmatpush1.bf16.msra.mxu0 %v2226_v16  ;;  %v2280_v57 = vld [vmem:[%s3214_s2 + $0xdc] ss:$12 sps:$4 sm:$0xff]   ;;  %v2296_v63 = vld [vmem:[%s3214_s2 + $0xf8] ss:$12 sps:$4 sm:$0xff]   ;;  %v2288_v0 = vld [vmem:[%s3214_s2 + $0xc0] ss:$12 sps:$4 sm:$0xff]  }
  0x4b   :  { %618 = vmatprep.subr.bf16.mxu0 %v2227_v18  ;;  %v2293_v59 = vld [vmem:[%s3214_s2 + $0x110] ss:$12 sps:$4 sm:$0xff]   ;;  %v2297_v3 = vld [vmem:[%s3214_s2 + $0x38] ss:$12 sps:$4 sm:$0xff]   ;;  %v2299_v4 = vld [vmem:[%s3214_s2 + $0xe0] ss:$12 sps:$4 sm:$0xff]  }
  0x4c   :  { %658 = vmatpush1.bf16.msra.mxu1 %v2256_v25  ;;  %v2294_v62 = vld [vmem:[%s3214_s2 + $0x50] ss:$12 sps:$4 sm:$0xff]   ;;  %v2300_v7 = vld [vmem:[%s3214_s2 + $0x20] ss:$12 sps:$4 sm:$0xff]   ;;  %v2302_v9 = vld [vmem:[%s3214_s2 + $0xc8] ss:$12 sps:$4 sm:$0xff]  }
  0x4d   :  { %659 = vmatprep.subr.bf16.mxu1 %v2259_v27  ;;  %v105_v2 = vld [vmem:[#allocation6] sm:$0xff]  ;;  %vm2598_vm0 = vmmov 0   ;;  %v2298_v13 = vld [vmem:[%s3214_s2 + $0x200] ss:$12 sps:$4 sm:$0xff]   ;;  %vm1334_vm1 = vcmask 523264  }
  0x4e   :  { %619 = vmatpush1.bf16.msra.mxu0 %v2231_v20  ;;  %v108_v5 = vpack.c.bf16 %v105_v2, %v105_v2  ;;  %v2292_v6 = vld [vmem:[%s3214_s2 + $0x230] ss:$12 sps:$4 sm:$0xff]   ;;  %v2295_v10 = vld [vmem:[%s3214_s2 + $0x218] ss:$12 sps:$4 sm:$0xff]   ;;  %v2303_v11 = vld [vmem:[%s3214_s2 + $0x8] ss:$12 sps:$4 sm:$0xff]  }
  0x4f   :  { %620 = vmatprep.subr.bf16.mxu0 %v2233_v21  ;;  %v2310_v12 = vld [vmem:[%s3216_s4 + $0x74] ss:$8 sps:$4 sm:$0xff]   ;;  %v2308_v14 = vld [vmem:[%s3216_s4 + $0x70] ss:$8 sps:$4 sm:$0xff]   ;;  %v2313_v15 = vld [vmem:[%s3216_s4 + $0x64] ss:$8 sps:$4 sm:$0xff]  }
  0x50   :  { %660 = vmatpush1.bf16.msra.mxu1 %v2262_v30  ;;  %v2301_v16 = vld [vmem:[%s3214_s2 + $0x1e8] ss:$12 sps:$4 sm:$0xff]   ;;  %v2304_v19 = vld [vmem:[%s3214_s2 + $0x1d0] ss:$12 sps:$4 sm:$0xff]   ;;  %v2319_v21 = vld [vmem:[%s3216_s4 + $0x44] ss:$8 sps:$4 sm:$0xff]  }
  0x51   :  { %661 = vmatprep.subr.bf16.mxu1 %v2265_v31  ;;  %v2311_v17 = vld [vmem:[%s3216_s4 + $0x60] ss:$8 sps:$4 sm:$0xff]   ;;  %v2316_v18 = vld [vmem:[%s3216_s4 + $0x54] ss:$8 sps:$4 sm:$0xff]   ;;  %v2314_v20 = vld [vmem:[%s3216_s4 + $0x50] ss:$8 sps:$4 sm:$0xff]  }
  0x52   :  { %621 = vmatpush1.bf16.msra.mxu0 %v2237_v24  ;;  %v2305_v22 = vld [vmem:[%s3214_s2 + $0x1b8] ss:$12 sps:$4 sm:$0xff]   ;;  %v2317_v23 = vld [vmem:[%s3216_s4 + $0x40] ss:$8 sps:$4 sm:$0xff]   ;;  %v2322_v24 = vld [vmem:[%s3216_s4 + $0x34] ss:$8 sps:$4 sm:$0xff]  }
  0x53   :  { %622 = vmatprep.subr.bf16.mxu0 %v2239_v26  ;;  %v2306_v25 = vld [vmem:[%s3214_s2 + $0x1a0] ss:$12 sps:$4 sm:$0xff]   ;;  %v2320_v26 = vld [vmem:[%s3216_s4 + $0x30] ss:$8 sps:$4 sm:$0xff]   ;;  %v2328_v30 = vld [vmem:[%s3216_s4 + $0x14] ss:$8 sps:$4 sm:$0xff]  }
  0x54   :  { %662 = vmatpush1.bf16.msra.mxu1 %v2268_v34  ;;  %v2325_v27 = vld [vmem:[%s3216_s4 + $0x24] ss:$8 sps:$4 sm:$0xff]   ;;  %v2326_v31 = vld [vmem:[%s3216_s4 + $0x10] ss:$8 sps:$4 sm:$0xff]   ;;  %v2334_v34 = vld [vmem:[%s3216_s4 + $0xf4] ss:$8 sps:$4 sm:$0xff]  }
  0x55   :  { %663 = vmatprep.subr.bf16.mxu1 %v2271_v35  ;;  %v2332_v35 = vld [vmem:[%s3216_s4 + $0xf0] ss:$8 sps:$4 sm:$0xff]   ;;  %v2343_v39 = vld [vmem:[%s3216_s4 + $0xc4] ss:$8 sps:$4 sm:$0xff]   ;;  %v2347_v44 = vld [vmem:[%s3216_s4 + $0xa0] ss:$8 sps:$4 sm:$0xff]  }
  0x56   :  { %623 = vmatpush1.bf16.msra.mxu0 %v2243_v28  ;;  %v2307_v28 = vld [vmem:[%s3214_s2 + $0x188] ss:$12 sps:$4 sm:$0xff]  }
  0x57   :  { %624 = vmatprep.subr.bf16.mxu0 %v2245_v29  ;;  %v2323_v29 = vld [vmem:[%s3216_s4 + $0x20] ss:$8 sps:$4 sm:$0xff]   ;;  %v2382_v2 = vld [vmem:[%s3218_s6 + $0x74] ss:$8 sps:$4 sm:$0xff]  }
  0x58   :  { %664 = vmatpush1.bf16.msra.mxu1 %v2274_v38  ;;  %v2338_v38 = vld [vmem:[%s3216_s4 + $0xd0] ss:$8 sps:$4 sm:$0xff]  }
  0x59   :  { %2097 = vmatprep.subr.bf16.mxu1 %v2277_v40  ;;  %v2341_v40 = vld [vmem:[%s3216_s4 + $0xc0] ss:$8 sps:$4 sm:$0xff]  }
  0x5a   :  { %625 = vmatpush2.bf16.msra.mxu0 %v2249_v32  ;;  %v2331_v32 = vld [vmem:[%s3216_s4 + $0x4] ss:$8 sps:$4 sm:$0xff]  }
  0x5b   :  { %626 = vmatprep.subr.bf16.mxu0 %v2251_v33  ;;  %682 = vmatmul.mubr.bf16.vlgmr.msra.gmra.mxu1 %v2817_v43  ;;  %v2329_v33 = vld [vmem:[%s3216_s4] ss:$8 sps:$4 sm:$0xff]  }
  0x5c   :  { %2098 = vmatpush3.bf16.msra.mxu1 %v2279_v45  ;;  %722 = vmatprep.mubr.bf16.mxu1 %v109_v46  ;;  %v2352_v45 = vld [vmem:[%s3216_s4 + $0x94] ss:$8 sps:$4 sm:$0xff]   ;;  %v2350_v46 = vld [vmem:[%s3216_s4 + $0x90] ss:$8 sps:$4 sm:$0xff]  }
  0x5d   :  { %2099 = vmatprep.subr.bf16.mxu1 %v2282_v47  ;;  %v2355_v47 = vld [vmem:[%s3216_s4 + $0x174] ss:$8 sps:$4 sm:$0xff]  }
  0x5e   :  { %627 = vmatpush2.bf16.msra.mxu0 %v2255_v36  ;;  %v2337_v36 = vld [vmem:[%s3216_s4 + $0xe4] ss:$8 sps:$4 sm:$0xff]  }
  0x5f   :  { %628 = vmatprep.subr.bf16.mxu0 %v2257_v37  ;;  %v2335_v37 = vld [vmem:[%s3216_s4 + $0xe0] ss:$8 sps:$4 sm:$0xff]  }
  0x60   :  { %2100 = vmatpush3.bf16.msra.mxu1 %v2284_v50  ;;  %v2356_v50 = vld [vmem:[%s3216_s4 + $0x80] ss:$8 sps:$4 sm:$0xff]  }
  0x61   :  { %2101 = vmatprep.subr.bf16.mxu1 %v2287_v51  ;;  %v2361_v51 = vld [vmem:[%s3216_s4 + $0x164] ss:$8 sps:$4 sm:$0xff]  }
  0x62   :  { %629 = vmatpush2.bf16.msra.mxu0 %v2261_v41  ;;  %v2346_v41 = vld [vmem:[%s3216_s4 + $0xb4] ss:$8 sps:$4 sm:$0xff]  }
  0x63   :  { %630 = vmatprep.subr.bf16.mxu0 %v2263_v42  ;;  %v2344_v42 = vld [vmem:[%s3216_s4 + $0xb0] ss:$8 sps:$4 sm:$0xff]  }
  0x64   :  { %2102 = vmatpush3.bf16.msra.mxu1 %v2289_v54  ;;  %v2364_v54 = vld [vmem:[%s3216_s4 + $0x154] ss:$8 sps:$4 sm:$0xff]  }
  0x65   :  { %2103 = vmatprep.subr.bf16.mxu1 %v2290_v55  ;;  %v2367_v55 = vld [vmem:[%s3216_s4 + $0x144] ss:$8 sps:$4 sm:$0xff]  }
  0x66   :  { %631 = vmatpush2.bf16.msra.mxu0 %v2267_v48  ;;  %v2353_v48 = vld [vmem:[%s3216_s4 + $0x170] ss:$8 sps:$4 sm:$0xff]  }
  0x67   :  { %632 = vmatprep.subr.bf16.mxu0 %v2269_v49  ;;  %v2358_v49 = vld [vmem:[%s3216_s4 + $0x84] ss:$8 sps:$4 sm:$0xff]  }
  0x68   :  { %2104 = vmatpush3.bf16.msra.mxu1 %v2291_v58  ;;  %v2368_v58 = vld [vmem:[%s3216_s4 + $0x130] ss:$8 sps:$4 sm:$0xff]  }
  0x69   :  { %2105 = vmatprep.subr.bf16.mxu1 %v2293_v59  ;;  %v2373_v59 = vld [vmem:[%s3216_s4 + $0x124] ss:$8 sps:$4 sm:$0xff]  }
  0x6a   :  { %633 = vmatpush2.bf16.msra.mxu0 %v2273_v52  ;;  %v2359_v52 = vld [vmem:[%s3216_s4 + $0x160] ss:$8 sps:$4 sm:$0xff]  }
  0x6b   :  { %634 = vmatprep.subr.bf16.mxu0 %v2275_v53  ;;  %v2362_v53 = vld [vmem:[%s3216_s4 + $0x150] ss:$8 sps:$4 sm:$0xff]  }
  0x6c   :  { %2106 = vmatpush3.bf16.msra.mxu1 %v2294_v62  ;;  %v2374_v62 = vld [vmem:[%s3216_s4 + $0x110] ss:$8 sps:$4 sm:$0xff]  }
  0x6d   :  { %2107 = vmatprep.subr.bf16.mxu1 %v2296_v63  ;;  %v2379_v63 = vld [vmem:[%s3216_s4 + $0x104] ss:$8 sps:$4 sm:$0xff]  }
  0x6e   :  { %635 = vmatpush2.bf16.msra.mxu0 %v2278_v56  ;;  %v2365_v56 = vld [vmem:[%s3216_s4 + $0x140] ss:$8 sps:$4 sm:$0xff]  }
  0x6f   :  { %636 = vmatprep.subr.bf16.mxu0 %v2280_v57  ;;  %v2370_v57 = vld [vmem:[%s3216_s4 + $0x134] ss:$8 sps:$4 sm:$0xff]  }
  0x70   :  { %2108 = vmatpush3.bf16.msra.mxu1 %v2297_v3  ;;  %v2388_v3 = vld [vmem:[#allocation8 + $0x74] ss:$8 sps:$4 sm:$0xff]  }
  0x71   :  { %2109 = vmatprep.subr.bf16.mxu1 %v2299_v4 }
  0x72   :  { %637 = vmatpush2.bf16.msra.mxu0 %v2283_v60  ;;  %v2371_v60 = vld [vmem:[%s3216_s4 + $0x120] ss:$8 sps:$4 sm:$0xff]  }
  0x73   :  { %638 = vmatprep.subr.bf16.mxu0 %v2285_v61  ;;  %v2376_v61 = vld [vmem:[%s3216_s4 + $0x114] ss:$8 sps:$4 sm:$0xff]  }
  0x74   :  { %2110 = vmatpush3.bf16.msra.mxu1 %v2300_v7 }
  0x75   :  { %2111 = vmatprep.subr.bf16.mxu1 %v2302_v9  ;;  %v209_v9 = vlaneseq }
  0x76   :  { %639 = vmatpush2.bf16.msra.mxu0 %v2288_v0  ;;  %v2377_v0 = vld [vmem:[%s3216_s4 + $0x100] ss:$8 sps:$4 sm:$0xff]  }
  0x77   :  { %2159 = vmatprep.subr.bf16.mxu0 %v2597_v8 }
  0x78   :  { %2112 = vmatpush3.bf16.msra.mxu1 %v2303_v11 }
  0x79   :  { %641 = vmatmul.mubr.bf16.vlgmr.msra.gmra.mxu0 %v108_v5  ;;  %1076 = vmatprep.subr.bf16.mxu1 %v2310_v12  ;;  %v207_v12 = vld [vmem:[%s3215_s3] sm:$0x7] }
  0x7a   :  { %2160 = vmatpush3.bf16.msra.mxu0 %v2292_v6  ;;  %2175 = vmatprep.mubr.msk.bf16.mxu0 %vm2598_vm0, %v2597_v8 }
  0x7b   :  { %2161 = vmatprep.subr.bf16.mxu0 %v2597_v8  ;;  %723 = vmatmul.mubr.bf16.vlgmr.msra.gmra.mxu1 %v108_v5 }
  0x7c   :  { %1077 = vmatpush1.bf16.msra.mxu1 %v2308_v14 }
  0x7d   :  { %1078 = vmatprep.subr.bf16.mxu1 %v2313_v15 }
  0x7e   :  { %2162 = vmatpush3.bf16.msra.mxu0 %v2295_v10  ;;  %v210_v10 = vshrl.u32 %v209_v9, 7  ;;  %v2430_v9 = vld [vmem:[#allocation8 + $0x4] ss:$8 sps:$4 sm:$0xff]  }
  0x7f   :  { %2163 = vmatprep.subr.bf16.mxu0 %v2597_v8 }
  0x80   :  { %1079 = vmatpush1.bf16.msra.mxu1 %v2311_v17  ;;  %v3075_v11 = vsub.s32 0, %v210_v10 }
  0x81   :  { %1080 = vmatprep.subr.bf16.mxu1 %v2316_v18 }
  0x82   :  { %2164 = vmatpush3.bf16.msra.mxu0 %v2298_v13  ;;  %v3080_v13 = vsub.s32 1, %v210_v10  ;;  %v212_v14 = vrot.slane %v207_v12, %v3075_v11 }
  0x83   :  { %2165 = vmatprep.subr.bf16.mxu0 %v2597_v8 }
  0x84   :  { %1081 = vmatpush1.bf16.msra.mxu1 %v2314_v20  ;;  %v216_v15 = vrot.slane %v207_v12, %v3080_v13 }
  0x85   :  { %1082 = vmatprep.subr.bf16.mxu1 %v2319_v21 }
  0x86   :  { %2166 = vmatpush3.bf16.msra.mxu0 %v2301_v16 }
  0x87   :  { %2167 = vmatprep.subr.bf16.mxu0 %v2597_v8 }
  0x88   :  { %1083 = vmatpush1.bf16.msra.mxu1 %v2317_v23 }
  0x89   :  { %1084 = vmatprep.subr.bf16.mxu1 %v2322_v24 }
  0x8a   :  { %2168 = vmatpush3.bf16.msra.mxu0 %v2304_v19 }
  0x8b   :  { %2169 = vmatprep.subr.bf16.mxu0 %v2597_v8 }
  0x8c   :  { %1085 = vmatpush1.bf16.msra.mxu1 %v2320_v26 }
  0x8d   :  { %1086 = vmatprep.subr.bf16.mxu1 %v2325_v27 }
  0x8e   :  { %2170 = vmatpush3.bf16.msra.mxu0 %v2305_v22 }
  0x8f   :  { %2171 = vmatprep.subr.bf16.mxu0 %v2597_v8 }
  0x90   :  { %1087 = vmatpush1.bf16.msra.mxu1 %v2323_v29 }
  0x91   :  { %1088 = vmatprep.subr.bf16.mxu1 %v2328_v30 }
  0x92   :  { %2172 = vmatpush3.bf16.msra.mxu0 %v2306_v25 }
  0x93   :  { %2173 = vmatprep.subr.bf16.mxu0 %v2597_v8 }
  0x94   :  { %1089 = vmatpush1.bf16.msra.mxu1 %v2326_v31  ;;  %v2385_v31 = vld [vmem:[%s3218_s6 + $0x64] ss:$8 sps:$4 sm:$0xff]  }
  0x95   :  { %1090 = vmatprep.subr.bf16.mxu1 %v2331_v32 }
  0x96   :  { %2174 = vmatpush3.bf16.msra.mxu0 %v2307_v28  ;;  %v2380_v28 = vld [vmem:[%s3218_s6 + $0x70] ss:$8 sps:$4 sm:$0xff]  }
  0x97   :  { %1117 = vmatprep.subr.bf16.mxu0 %v2355_v47 }
  0x98   :  { %1091 = vmatpush1.bf16.msra.mxu1 %v2329_v33  ;;  %v2383_v33 = vld [vmem:[%s3218_s6 + $0x60] ss:$8 sps:$4 sm:$0xff]  }
  0x99   :  { %2176 = vmatmul.mubr.bf16.vlgmr.msra.gmra.mxu0 %v2817_v43  ;;  %1092 = vmatprep.subr.bf16.mxu1 %v2334_v34  ;;  %v2349_v43 = vld [vmem:[%s3216_s4 + $0xa4] ss:$8 sps:$4 sm:$0xff]  }
  0x9a   :  { %1149 = vmatprep.mubr.bf16.mxu0 %v2596_v1  ;;  %v2340_v1 = vld [vmem:[%s3216_s4 + $0xd4] ss:$8 sps:$4 sm:$0xff]   ;;  %1118 = vmatpush1.bf16.msra.mxu0 %v2353_v48 }
  0x9b   :  { %1119 = vmatprep.subr.bf16.mxu0 %v2361_v51  ;;  %v2394_v51 = vld [vmem:[#allocation8 + $0x64] ss:$8 sps:$4 sm:$0xff]  }
  0x9c   :  { %1093 = vmatpush2.bf16.msra.mxu1 %v2332_v35  ;;  %v2391_v35 = vld [vmem:[%s3218_s6 + $0x54] ss:$8 sps:$4 sm:$0xff]  }
  0x9d   :  { %1094 = vmatprep.subr.bf16.mxu1 %v2337_v36  ;;  %v2389_v36 = vld [vmem:[%s3218_s6 + $0x50] ss:$8 sps:$4 sm:$0xff]  }
  0x9e   :  { %1120 = vmatpush1.bf16.msra.mxu0 %v2359_v52 }
  0x9f   :  { %1121 = vmatprep.subr.bf16.mxu0 %v2364_v54  ;;  %v2400_v54 = vld [vmem:[#allocation8 + $0x54] ss:$8 sps:$4 sm:$0xff]  }
  0xa0   :  { %1095 = vmatpush2.bf16.msra.mxu1 %v2335_v37  ;;  %v2397_v37 = vld [vmem:[%s3218_s6 + $0x44] ss:$8 sps:$4 sm:$0xff]  }
  0xa1   :  { %1096 = vmatprep.subr.bf16.mxu1 %v2340_v1  ;;  %v2395_v1 = vld [vmem:[%s3218_s6 + $0x40] ss:$8 sps:$4 sm:$0xff]  }
  0xa2   :  { %1122 = vmatpush1.bf16.msra.mxu0 %v2362_v53  ;;  %v2392_v53 = vld [vmem:[#allocation8 + $0x60] ss:$8 sps:$4 sm:$0xff]  }
  0xa3   :  { %1123 = vmatprep.subr.bf16.mxu0 %v2367_v55  ;;  %v2398_v55 = vld [vmem:[#allocation8 + $0x50] ss:$8 sps:$4 sm:$0xff]  }
  0xa4   :  { %1097 = vmatpush2.bf16.msra.mxu1 %v2338_v38  ;;  %v2403_v38 = vld [vmem:[%s3218_s6 + $0x34] ss:$8 sps:$4 sm:$0xff]  }
  0xa5   :  { %1098 = vmatprep.subr.bf16.mxu1 %v2343_v39  ;;  %v219_v39 = vsub.s32 2, %v210_v10  ;;  %v2425_v10 = vld [vmem:[%s3218_s6 + $0xb0] ss:$8 sps:$4 sm:$0xff]  }
  0xa6   :  { %1124 = vmatpush1.bf16.msra.mxu0 %v2365_v56  ;;  %v2406_v56 = vld [vmem:[#allocation8 + $0x44] ss:$8 sps:$4 sm:$0xff]  }
  0xa7   :  { %1125 = vmatprep.subr.bf16.mxu0 %v2370_v57  ;;  %v2404_v57 = vld [vmem:[#allocation8 + $0x40] ss:$8 sps:$4 sm:$0xff]  }
  0xa8   :  { %1099 = vmatpush2.bf16.msra.mxu1 %v2341_v40  ;;  %v2401_v40 = vld [vmem:[%s3218_s6 + $0x30] ss:$8 sps:$4 sm:$0xff]  }
  0xa9   :  { %1100 = vmatprep.subr.bf16.mxu1 %v2346_v41 }
  0xaa   :  { %1126 = vmatpush1.bf16.msra.mxu0 %v2368_v58  ;;  %v2409_v58 = vld [vmem:[%s3218_s6 + $0x24] ss:$8 sps:$4 sm:$0xff]  }
  0xab   :  { %1127 = vmatprep.subr.bf16.mxu0 %v2373_v59  ;;  %v2407_v59 = vld [vmem:[%s3218_s6 + $0x20] ss:$8 sps:$4 sm:$0xff]  }
  0xac   :  { %1101 = vmatpush2.bf16.msra.mxu1 %v2344_v42  ;;  %v220_v42 = vrot.slane %v207_v12, %v219_v39  ;;  %v2433_v12 = vld [vmem:[%s3218_s6 + $0xa4] ss:$8 sps:$4 sm:$0xff]  }
  0xad   :  { %1102 = vmatprep.subr.bf16.mxu1 %v2349_v43 }
  0xae   :  { %1128 = vmatpush1.bf16.msra.mxu0 %v2371_v60  ;;  %v2412_v60 = vld [vmem:[#allocation8 + $0x34] ss:$8 sps:$4 sm:$0xff]  }
  0xaf   :  { %1129 = vmatprep.subr.bf16.mxu0 %v2376_v61  ;;  %v2410_v61 = vld [vmem:[#allocation8 + $0x30] ss:$8 sps:$4 sm:$0xff]  }
  0xb0   :  { %1103 = vmatpush2.bf16.msra.mxu1 %v2347_v44 }
  0xb1   :  { %1104 = vmatprep.subr.bf16.mxu1 %v2352_v45 }
  0xb2   :  { %1130 = vmatpush1.bf16.msra.mxu0 %v2374_v62  ;;  %v2415_v62 = vld [vmem:[%s3218_s6 + $0x14] ss:$8 sps:$4 sm:$0xff]  }
  0xb3   :  { %1131 = vmatprep.subr.bf16.mxu0 %v2379_v63  ;;  %v2413_v63 = vld [vmem:[%s3218_s6 + $0x10] ss:$8 sps:$4 sm:$0xff]  }
  0xb4   :  { %1105 = vmatpush2.bf16.msra.mxu1 %v2350_v46 }
  0xb5   :  { %1106 = vmatprep.subr.bf16.mxu1 %v2358_v49  ;;  %v2386_v49 = vld [vmem:[#allocation8 + $0x70] ss:$8 sps:$4 sm:$0xff]  }
  0xb6   :  { %1132 = vmatpush1.bf16.msra.mxu0 %v2377_v0  ;;  %v2416_v0 = vld [vmem:[#allocation8 + $0x20] ss:$8 sps:$4 sm:$0xff]  }
  0xb7   :  { %1338 = vmatprep.subr.bf16.mxu0 %v2388_v3  ;;  %v2421_v3 = vld [vmem:[%s3218_s6 + $0x4] ss:$8 sps:$4 sm:$0xff]  }
  0xb8   :  { %1107 = vmatpush2.bf16.msra.mxu1 %v2356_v50 }
  0xb9   :  { %1502 = vmatprep.subr.bf16.mxu1 %v2382_v2  ;;  %v2418_v2 = vld [vmem:[#allocation8 + $0x24] ss:$8 sps:$4 sm:$0xff]  }
 0x11b   :  { %v683_v4 = vpop.f32.mrf.mxu1 }
 0x11d   :  { %v685_v5 = vpop.f32.mrf.mxu1 }
 0x11f   :  { %v687_v6 = vpop.f32.mrf.mxu1 }
 0x120   :  { %v2427_v6 = vld [vmem:[%s3218_s6 + $0xb4] ss:$8 sps:$4 sm:$0xff]  }
 0x121   :  { %v688_v7 = vpop.f32.mrf.mxu1 }
 0x122   :  { %v2422_v7 = vld [vmem:[#allocation8 + $0x10] ss:$8 sps:$4 sm:$0xff]  }
 0x139   :  { %v642_v16 = vpop.f32.mrf.mxu0 }
 0x13a   :  { %v643_v17 = vadd.f32 %v642_v16, %v212_v14  ;;  %v2428_v14 = vld [vmem:[#allocation8] ss:$8 sps:$4 sm:$0xff]  }
 0x13b   :  { %v644_v18 = vpop.f32.mrf.mxu0  ;;  %v2113_v26 = vpop.f32.mrf.mxu1  ;;  %v2431_v16 = vld [vmem:[%s3218_s6 + $0xa0] ss:$8 sps:$4 sm:$0xff]  }
 0x13c   :  { %v684_v19 = vadd.f32 %v683_v4, %v643_v17  ;;  %v645_v20 = vadd.f32 %v644_v18, %v216_v15  ;;  %v2419_v4 = vld [vmem:[%s3218_s6] ss:$8 sps:$4 sm:$0xff]   ;;  %v2439_v17 = vld [vmem:[%s3218_s6 + $0x94] ss:$8 sps:$4 sm:$0xff]  }
 0x13d   :  { %v646_v21 = vpop.f32.mrf.mxu0  ;;  %v2114_v30 = vpop.f32.mrf.mxu1  ;;  %v2436_v15 = vld [vmem:[#allocation8 + $0xb4] ss:$8 sps:$4 sm:$0xff]   ;;  %v2434_v18 = vld [vmem:[#allocation8 + $0xb0] ss:$8 sps:$4 sm:$0xff]  }
 0x13e   :  { %v686_v22 = vadd.f32 %v685_v5, %v645_v20  ;;  %v770_v23 = vmax.f32 %v684_v19, 0.0  ;;  %v2115_v41 = vadd.f32 %v2114_v30, %v2113_v26  ;;  %v2424_v5 = vld [vmem:[#allocation8 + $0x14] ss:$8 sps:$4 sm:$0xff]   ;;  %v2442_v19 = vld [vmem:[#allocation8 + $0xa4] ss:$8 sps:$4 sm:$0xff]  }
 0x13f   :  { %v647_v24 = vpop.f32.mrf.mxu0  ;;  %v2116_v32 = vpop.f32.mrf.mxu1  ;;  %v2437_v20 = vld [vmem:[%s3218_s6 + $0x90] ss:$8 sps:$4 sm:$0xff]  }
 0x140   :  { %v771_v25 = vmax.f32 %v686_v22, 0.0  ;;  %v773_v29 = vpack.c.bf16 %v770_v23, %v770_v23  ;;  %v725_v43 = vadd.f32 %v2115_v41, %v220_v42  ;;  %v2440_v21 = vld [vmem:[#allocation8 + $0xa0] ss:$8 sps:$4 sm:$0xff]   ;;  %v2448_v24 = vld [vmem:[#allocation8 + $0x94] ss:$8 sps:$4 sm:$0xff]  }
 0x141   :  { %v2117_v34 = vpop.f32.mrf.mxu1  ;;  %v2445_v22 = vld [vmem:[%s3218_s6 + $0x84] ss:$8 sps:$4 sm:$0xff]   ;;  %v2443_v23 = vld [vmem:[%s3218_s6 + $0x80] ss:$8 sps:$4 sm:$0xff]  }
 0x142   :  { %v774_v27 = vpack.c.bf16 %v771_v25, %v771_v25  ;;  %v1161_v25 = vld [vmem:[#allocation3 + $0x8] sm:$0xff]  ;;  %v2446_v26 = vld [vmem:[#allocation8 + $0x90] ss:$8 sps:$4 sm:$0xff]  }
 0x143   :  { %v2451_v30 = vld [vmem:[#allocation8 + $0x84] ss:$8 sps:$4 sm:$0xff]   ;;  %v2452_v32 = vld [vmem:[#allocation9 + $0x78] sm:$0xff]  }
 0x144   :  { %1108 = vmatprep.mubr.bf16.mxu1 %v774_v27  ;;  %v1163_v27 = vpack.c.bf16 %v1161_v25, %v1161_v25 }
 0x145   :  { %1109 = vmatmul.mubr.bf16.vlgmr.msra.gmra.mxu1 %v773_v29 }
 0x146   :  { %1503 = vmatpush1.bf16.msra.mxu1 %v2380_v28  ;;  %v1160_v28 = vld [vmem:[#allocation3] sm:$0xff]  ;;  %2067 = vmatprep.mubr.msk.bf16.mxu1 %vm1334_vm1, %v1163_v27 }
 0x147   :  { %1504 = vmatprep.subr.bf16.mxu1 %v2385_v31  ;;  %v1162_v29 = vpack.c.bf16 %v1160_v28, %v1160_v28  ;;  %v2449_v31 = vld [vmem:[#allocation8 + $0x80] ss:$8 sps:$4 sm:$0xff]  }
 0x14a   :  { %1505 = vmatpush1.bf16.msra.mxu1 %v2383_v33 }
 0x14b   :  { %1506 = vmatprep.subr.bf16.mxu1 %v2391_v35 }
 0x14e   :  { %1507 = vmatpush1.bf16.msra.mxu1 %v2389_v36 }
 0x14f   :  { %1508 = vmatprep.subr.bf16.mxu1 %v2397_v37  ;;  %v824_v37 = vld [vmem:[%s3217_s5] sm:$0x3] }
 0x152   :  { %1509 = vmatpush1.bf16.msra.mxu1 %v2395_v1  ;;  %v829_v1 = vrot.slane %v824_v37, %v3075_v11 }
 0x153   :  { %1510 = vmatprep.subr.bf16.mxu1 %v2403_v38  ;;  %v833_v38 = vrot.slane %v824_v37, %v3080_v13 }
 0x156   :  { %1511 = vmatpush1.bf16.msra.mxu1 %v2401_v40 }
 0x157   :  { %1512 = vmatprep.subr.bf16.mxu1 %v2409_v58  ;;  %v2460_v58 = vld [vmem:[#allocation9 + $0x58] sm:$0xff]  }
 0x159   :  { %v764_v44 = vpop.f32.mrf.mxu0 }
 0x15a   :  { %v765_v45 = vadd.f32 %v764_v44, %v725_v43  ;;  %1513 = vmatpush1.bf16.msra.mxu1 %v2407_v59  ;;  %v2461_v59 = vld [vmem:[#allocation9 + $0x18] sm:$0xff]  }
 0x15b   :  { %v2177_v46 = vpop.f32.mrf.mxu0  ;;  %1514 = vmatprep.subr.bf16.mxu1 %v2415_v62 }
 0x15c   :  { %v772_v47 = vmax.f32 %v765_v45, 0.0 }
 0x15d   :  { %v767_v48 = vpop.f32.mrf.mxu0 }
 0x15e   :  { %v775_v50 = vpack.c.bf16 %v772_v47, %v772_v47  ;;  %1515 = vmatpush1.bf16.msra.mxu1 %v2413_v63  ;;  %v2462_v63 = vld [vmem:[#allocation9 + $0x50] sm:$0xff]  }
 0x15f   :  { %v2178_v52 = vpop.f32.mrf.mxu0  ;;  %1516 = vmatprep.subr.bf16.mxu1 %v2421_v3  ;;  %v2464_v3 = vld [vmem:[#allocation9 + $0x48] sm:$0xff]  }
 0x160   :  { %1150 = vmatmul.mubr.bf16.vlgmr.msra.gmra.mxu0 %v775_v50  ;;  %v2453_v50 = vld [vmem:[#allocation9 + $0x38] sm:$0xff]   ;;  %v2454_v52 = vld [vmem:[#allocation9 + $0x70] sm:$0xff]  }
 0x161   :  { %1339 = vmatpush1.bf16.msra.mxu0 %v2386_v49 }
 0x162   :  { %1340 = vmatprep.subr.bf16.mxu0 %v2394_v51  ;;  %1517 = vmatpush1.bf16.msra.mxu1 %v2419_v4  ;;  %v2465_v4 = vld [vmem:[#allocation9 + $0x8] sm:$0xff]  }
 0x163   :  { %1526 = vmatprep.subr.bf16.mxu1 %v2427_v6  ;;  %v2467_v6 = vld [vmem:[#allocation9] sm:$0xff]  }
 0x165   :  { %1341 = vmatpush1.bf16.msra.mxu0 %v2392_v53  ;;  %v2455_v53 = vld [vmem:[#allocation9 + $0x30] sm:$0xff]  }
 0x166   :  { %1342 = vmatprep.subr.bf16.mxu0 %v2400_v54  ;;  %1527 = vmatpush2.bf16.msra.mxu1 %v2425_v10  ;;  %v2456_v54 = vld [vmem:[#allocation9 + $0x68] sm:$0xff]   ;;  %v2470_v10 = vld [vmem:[%s3223_s11 + $0x28] sm:$0xff]  }
 0x167   :  { %1528 = vmatprep.subr.bf16.mxu1 %v2433_v12  ;;  %v2471_v12 = vld [vmem:[%s3223_s11 + $0x20] sm:$0xff]  }
 0x169   :  { %1343 = vmatpush1.bf16.msra.mxu0 %v2398_v55  ;;  %v2457_v55 = vld [vmem:[#allocation9 + $0x28] sm:$0xff]  }
 0x16a   :  { %1344 = vmatprep.subr.bf16.mxu0 %v2406_v56  ;;  %1529 = vmatpush2.bf16.msra.mxu1 %v2431_v16  ;;  %v2458_v56 = vld [vmem:[#allocation9 + $0x60] sm:$0xff]  }
 0x16b   :  { %1530 = vmatprep.subr.bf16.mxu1 %v2439_v17 }
 0x16d   :  { %1345 = vmatpush1.bf16.msra.mxu0 %v2404_v57  ;;  %v2459_v57 = vld [vmem:[#allocation9 + $0x20] sm:$0xff]  }
 0x16e   :  { %1346 = vmatprep.subr.bf16.mxu0 %v2412_v60  ;;  %1531 = vmatpush2.bf16.msra.mxu1 %v2437_v20 }
 0x16f   :  { %1532 = vmatprep.subr.bf16.mxu1 %v2445_v22 }
 0x171   :  { %1347 = vmatpush1.bf16.msra.mxu0 %v2410_v61 }
 0x172   :  { %1348 = vmatprep.subr.bf16.mxu0 %v2418_v2  ;;  %1533 = vmatpush2.bf16.msra.mxu1 %v2443_v23 }
 0x173   :  { %2179 = vmatprep.subr.bf16.mxu1 %v2597_v8 }
 0x175   :  { %1349 = vmatpush1.bf16.msra.mxu0 %v2416_v0  ;;  %1535 = vmatmul.mubr.bf16.vlgmr.msra.gmra.mxu1 %v1162_v29  ;;  %v2463_v0 = vld [vmem:[#allocation9 + $0x10] sm:$0xff]  }
 0x176   :  { %1350 = vmatprep.subr.bf16.mxu0 %v2424_v5  ;;  %2195 = vmatprep.mubr.msk.bf16.mxu1 %vm2598_vm0, %v2597_v8  ;;  %v2466_v5 = vld [vmem:[#allocation9 + $0x40] sm:$0xff]  }
 0x179   :  { %1351 = vmatpush1.bf16.msra.mxu0 %v2422_v7  ;;  %v2468_v7 = vld [vmem:[%s3223_s11 + $0x38] sm:$0xff]  }
 0x17a   :  { %1352 = vmatprep.subr.bf16.mxu0 %v2430_v9  ;;  %2180 = vmatpush3.bf16.msra.mxu1 %v2468_v7  ;;  %v2469_v9 = vld [vmem:[%s3223_s11 + $0x30] sm:$0xff]  }
 0x17b   :  { %2181 = vmatprep.subr.bf16.mxu1 %v2597_v8 }
 0x17d   :  { %1353 = vmatpush1.bf16.msra.mxu0 %v2428_v14  ;;  %v2472_v14 = vld [vmem:[%s3223_s11 + $0x18] sm:$0xff]  }
 0x17e   :  { %1362 = vmatprep.subr.bf16.mxu0 %v2436_v15  ;;  %2182 = vmatpush3.bf16.msra.mxu1 %v2469_v9  ;;  %v1543_v15 = vld [vmem:[%s3220_s8] sm:$0x3] }
 0x17f   :  { %2183 = vmatprep.subr.bf16.mxu1 %v2597_v8  ;;  %v1548_v16 = vrot.slane %v1543_v15, %v3075_v11  ;;  %v2473_v11 = vld [vmem:[%s3223_s11 + $0x10] sm:$0xff]  }
 0x181   :  { %1363 = vmatpush2.bf16.msra.mxu0 %v2434_v18 }
 0x182   :  { %1364 = vmatprep.subr.bf16.mxu0 %v2442_v19  ;;  %2184 = vmatpush3.bf16.msra.mxu1 %v2470_v10  ;;  %v1552_v19 = vrot.slane %v1543_v15, %v3080_v13  ;;  %v2474_v13 = vld [vmem:[%s3223_s11 + $0x8] sm:$0xff]  }
 0x183   :  { %2185 = vmatprep.subr.bf16.mxu1 %v2597_v8 }
 0x185   :  { %1365 = vmatpush2.bf16.msra.mxu0 %v2440_v21 }
 0x186   :  { %1366 = vmatprep.subr.bf16.mxu0 %v2448_v24  ;;  %2186 = vmatpush3.bf16.msra.mxu1 %v2471_v12 }
 0x187   :  { %2187 = vmatprep.subr.bf16.mxu1 %v2597_v8 }
 0x189   :  { %1367 = vmatpush2.bf16.msra.mxu0 %v2446_v26 }
 0x18a   :  { %1368 = vmatprep.subr.bf16.mxu0 %v2451_v30  ;;  %2188 = vmatpush3.bf16.msra.mxu1 %v2472_v14  ;;  %v2475_v30 = vld [vmem:[%s3223_s11] sm:$0xff]  }
 0x18b   :  { %2189 = vmatprep.subr.bf16.mxu1 %v2597_v8 }
 0x18d   :  { %1369 = vmatpush2.bf16.msra.mxu0 %v2449_v31 }
 0x18e   :  { %2128 = vmatprep.subr.bf16.mxu0 %v2452_v32  ;;  %2190 = vmatpush3.bf16.msra.mxu1 %v2473_v11  ;;  %v2068_v32 = vld [vmem:[%s3222_s10] ss:$0 sm:$0xff]  ;;  %s2599_s10 = smov [#allocation11]  }
 0x18f   :  { %2191 = vmatprep.subr.bf16.mxu1 %v2597_v8 }
 0x192   :  { %2192 = vmatpush3.bf16.msra.mxu1 %v2474_v13 }
 0x193   :  { %2193 = vmatprep.subr.bf16.mxu1 %v2597_v8  ;;  %v2085_v8 = vld [vmem:[%s3224_s12] ss:$0 sm:$0xff]  ;;  %s1887_s12 = sshll.u32 %s2599_s10, 4  ;;  %s1888_s12 = int_to_ptr.vmem [resolvable:$true] %s1887_s12 }
 0x194   :  { %p2565_p7 = scmp.lt.s32.totalorder %s1888_s12, %s1888_s12 }
 0x196   :  { %2194 = vmatpush3.bf16.msra.mxu1 %v2475_v30 }
 0x205   :  { %v1110_v33 = vpop.f32.mrf.mxu1 }
 0x206   :  { %v1111_v39 = vadd.f32 %v1110_v33, %v829_v1 }
 0x207   :  { %v1112_v34 = vpop.f32.mrf.mxu1 }
 0x208   :  { %v1113_v41 = vadd.f32 %v1112_v34, %v833_v38 }
 0x209   :  { %v1114_v35 = vpop.f32.mrf.mxu1 }
 0x20b   :  { %v1115_v36 = vpop.f32.mrf.mxu1 }
 0x220   :  { %v1151_v40 = vpop.f32.mrf.mxu0 }
 0x221   :  { %v1152_v42 = vadd.f32 %v1151_v40, %v1111_v39 }
 0x222   :  { %v1153_v43 = vpop.f32.mrf.mxu0 }
 0x223   :  { %v1154_v44 = vadd.f32 %v1153_v43, %v1113_v41  ;;  %v1158_v45 = vmax.f32 %v1152_v42, 0.0  ;;  %v2094_v42 = vld [vmem:[%s3225_s13] ss:$0 sm:$0xff]  ;;  %s2560_s13 = scalar_lea.vmem %s1888_s12, 128 }
 0x224   :  { %v1155_v46 = vpop.f32.mrf.mxu0  ;;  %p2561_p6 = scmp.ne.s32.totalorder %s1888_s12, %s2560_s13  ;;  %p2566_p8 = scmp.lt.s32.totalorder %s2560_s13, %s2560_s13 }
 0x225   :  { %v1159_v47 = vmax.f32 %v1154_v44, 0.0  ;;  %v1188_v51 = vpack.c.bf16 %v1158_v45, %v1158_v45 }
 0x226   :  { %v1156_v48 = vpop.f32.mrf.mxu0  ;;  %p2567_p9 = por %p2566_p8, %p2565_p7 }
 0x227   :  { %v1189_v49 = vpack.c.bf16 %v1159_v47, %v1159_v47  ;;  %v2095_v48 = vld [vmem:[#allocation2] ss:$0 sm:$0xff] }
 0x228   :  { %p2568_p10 = pnand %p2567_p9, %p2561_p6 }
 0x229   :  { %2042 = vmatprep.mubr.msk.bf16.mxu0 %vm1334_vm1, %v1189_v49 }
 0x22a   :  { %1371 = vmatmul.mubr.bf16.vlgmr.msra.gmra.mxu0 %v1188_v51 }
 0x22b   :  { %2129 = vmatpush3.bf16.msra.mxu0 %v2453_v50 }
 0x22c   :  { %2130 = vmatprep.subr.bf16.mxu0 %v2454_v52 }
 0x22f   :  { %2131 = vmatpush3.bf16.msra.mxu0 %v2455_v53 }
 0x230   :  { %2132 = vmatprep.subr.bf16.mxu0 %v2456_v54 }
 0x233   :  { %2133 = vmatpush3.bf16.msra.mxu0 %v2457_v55 }
 0x234   :  { %2134 = vmatprep.subr.bf16.mxu0 %v2458_v56 }
 0x235   :  { %v1536_v60 = vpop.f32.mrf.mxu1 }
 0x237   :  { %2135 = vmatpush3.bf16.msra.mxu0 %v2459_v57  ;;  %v1538_v61 = vpop.f32.mrf.mxu1 }
 0x238   :  { %2136 = vmatprep.subr.bf16.mxu0 %v2460_v58 }
 0x239   :  { %v1540_v62 = vpop.f32.mrf.mxu1 }
 0x23b   :  { %2137 = vmatpush3.bf16.msra.mxu0 %v2461_v59  ;;  %v1541_v2 = vpop.f32.mrf.mxu1 }
 0x23c   :  { %2138 = vmatprep.subr.bf16.mxu0 %v2462_v63 }
 0x23f   :  { %2139 = vmatpush3.bf16.msra.mxu0 %v2463_v0 }
 0x240   :  { %2140 = vmatprep.subr.bf16.mxu0 %v2464_v3 }
 0x243   :  { %2141 = vmatpush3.bf16.msra.mxu0 %v2465_v4 }
 0x244   :  { %2142 = vmatprep.subr.bf16.mxu0 %v2466_v5 }
 0x247   :  { %2143 = vmatpush3.bf16.msra.mxu0 %v2467_v6 }
 0x2ea   :  { %v1372_v17 = vpop.f32.mrf.mxu0 }
 0x2eb   :  { %v1537_v18 = vadd.f32 %v1536_v60, %v1372_v17 }
 0x2ec   :  { %v1374_v20 = vpop.f32.mrf.mxu0 }
 0x2ed   :  { %v1555_v21 = vadd.f32 %v1548_v16, %v1537_v18  ;;  %v1539_v22 = vadd.f32 %v1538_v61, %v1374_v20 }
 0x2ee   :  { %v1376_v23 = vpop.f32.mrf.mxu0 }
 0x2ef   :  { %v1556_v24 = vadd.f32 %v1552_v19, %v1539_v22  ;;  %v1557_v25 = vmax.f32 %v1555_v21, 0.0 }
 0x2f0   :  { %v1377_v26 = vpop.f32.mrf.mxu0 }
 0x2f1   :  { %v1558_v27 = vmax.f32 %v1556_v24, 0.0  ;;  %v1559_v29 = vpack.c.bf16 %v1557_v25, %v1557_v25 }
 0x2f3   :  { %v1560_v28 = vpack.c.bf16 %v1558_v27, %v1558_v27 }
 0x2f5   :  { %1728 = vmatprep.mubr.bf16.mxu0 %v1560_v28 }
 0x2f6   :  { %1729 = vmatmul.mubr.bf16.vlgmr.msra.gmra.mxu0 %v1559_v29 }
 0x3b6   :  { %v2144_v31 = vpop.f32.mrf.mxu0 }
 0x3b8   :  { %v2145_v33 = vpop.f32.mrf.mxu0 }
 0x3b9   :  { %v2146_v34 = vadd.f32 %v2145_v33, %v2144_v31 }
 0x3ba   :  { %v2147_v35 = vpop.f32.mrf.mxu0 }
 0x3bb   :  { %v1731_v36 = vadd.f32 %v2146_v34, %v2068_v32 }
 0x3bc   :  { %v2148_v37 = vpop.f32.mrf.mxu0 }
 0x3bd   :  { %v1736_v1 = vmax.f32 %v1731_v36, 0.0 }
 0x3bf   :  { %v1737_v38 = vpack.c.bf16 %v1736_v1, %v1736_v1 }
 0x3c1   :  { %2196 = vmatmul.mubr.bf16.vlgmr.msra.gmra.mxu1 %v1737_v38 }
 0x481   :  { %v1843_v39 = vpop.f32.mrf.mxu1 }
 0x482   :  { %v1844_v40 = vadd.f32 %v2085_v8, %v1843_v39 }
 0x483   :  { %v2197_v41 = vpop.f32.mrf.mxu1 }
 0x484   :  { %v1849_v43 = vmax.f32 %v1844_v40, 0.0 }
 0x485   :  { %v1846_v44 = vpop.f32.mrf.mxu1 }
 0x486   :  { %v1857_v45 = vmul.f32 %v2094_v42, %v1849_v43 }
 0x487   :  { %v2198_v46 = vpop.f32.mrf.mxu1 }
 0x488   :  { %v1858_v47 = vsel %vm1334_vm1, %v1857_v45, 0.0 }
 0x489   :  { %1859 = vadd.xlane.f32.xlu0 %v1858_v47 }
 0x512   :  { %v1860_v49 = vpop.xlane.xlu0 %1859 }
 0x513   :  { %v1868_v50 = vadd.f32 %v2095_v48, %v1860_v49 }
 0x515   :  { %v2096_v51 = vmul.f32 -1.442695, %v1868_v50 }
 0x517   :  { %2476 = vpow2.f32 %v2096_v51 }
 0x524   :  { %v2477_v52 = vpop.eup %2476 }
 0x525   :  { %v1872_v53 = vadd.f32 1.0, %v2477_v52 }
 0x527   :  { %2478 = vrcp.f32 %v1872_v53 }
 0x534   :  { %v2479_v54 = vpop.eup %2478 }
 0x535   :  { %1877 = vperm.xlu0 %2211, %v2479_v54  }
 0x5b0   :  { %v1878_v55 = vpop.permute.xlu0 %1877 }
 0x5b1   :  { %1880 = vst [vmem:[#allocation11] sm:$0xff] %v1878_v55 }
 0x5b2   :  { %2571 = shalt.err (!%p2568_p10)
}
 0x5b3   :  { %1890 = dma.vmem_to_hbm [thread:$0]  %s1888_s12, 128, %s3227_s15, [#allocation5]  }
 0x5b4   :  { %2586 = dma.done.wait [#allocation5], 128  }
 0x5b5   :  { %2587 = vsyncadd [#allocation5], 4294967168 }
 0x5b6   :  { %1894 = vsyncpa [#allocation4], 1 }
 0x5b7   :  { %1895 = vsyncpa [#allocation7], 1 }
 0x5b8   :  { %1896 = vsyncpa [#allocation10], 1 }
 0x5b9   :  { %1897 = vsyncpa [#allocation5], 1 }

</bundles_post_ra>
